<compile_context>
chip_gen: v5e
topology: v5e:2x2
jax: 0.10.0
libtpu: 0.0.40
codegen_flags: <defaults>
</compile_context>

<pallas_src>
import functools

import jax
import jax.numpy as jnp
from jax import lax
from jax.experimental import pallas as pl
from jax.experimental.pallas import tpu as pltpu


def _proxy_nca_kernel(x_ref, p_ref, t_ref, o_ref,
                      xn_ref, m_ref, l_ref, sd_ref, dl_ref,
                      *, smoothing_const, c_real, needs_mask):
    """One (batch-tile i, class-tile j) grid step.

    Layout: the softmax path is (TILE_C, TILE_N) — batch on the lanes — so all
    per-row reductions are lane-dense (1, TILE_N) vectors.
    """
    j = pl.program_id(1)
    tile_n = x_ref.shape[0]
    tile_c = p_ref.shape[0]

    # --- first class step of each batch tile: normalize X once, zero accs ---
    @pl.when(j == 0)
    def _init():
        x = x_ref[...].astype(jnp.float32)                       # (TILE_N, D)
        ss = jnp.sum(x * x, axis=-1, keepdims=True)
        # eps semantics: max(norm^2, 1e-24) ~ reference's max(norm, 1e-12).
        xn = (3.0 * x) * lax.rsqrt(jnp.maximum(ss, 1e-24))
        xn_ref[...] = xn.astype(xn_ref.dtype)
        m_ref[...] = jnp.full((1, tile_n), -jnp.inf, jnp.float32)
        l_ref[...] = jnp.zeros((1, tile_n), jnp.float32)
        sd_ref[...] = jnp.zeros((1, tile_n), jnp.float32)
        dl_ref[...] = jnp.zeros((1, tile_n), jnp.float32)

    # --- cross[c, n] = <pn_c, xn_n>  (NT contraction, no transposes) ---
    cross = lax.dot_general(p_ref[...], xn_ref[...],
                            (((1,), (1,)), ((), ())),
                            preferred_element_type=jnp.float32)  # (TILE_C, TILE_N)

    # ||xn||^2 = ||pn||^2 = 9 exactly after normalization; keep the clamp.
    d = jnp.maximum(18.0 - 2.0 * cross, 0.0)

    col = j * tile_c + lax.broadcasted_iota(jnp.int32, (tile_c, 1), 0)
    if needs_mask:
        valid = col < c_real                                     # (TILE_C, 1)
        d_lse = jnp.where(valid, d, -1e30)   # padded classes: exp -> 0
        d_sum = jnp.where(valid, d, 0.0)     # ...and excluded from row sums
    else:
        d_lse = d
        d_sum = d

    labels = t_ref[0]                                            # (1, TILE_N)
    onehot = col == labels                                       # (TILE_C, TILE_N)

    # --- streaming (online) log-sum-exp over the class axis ---
    m_prev = m_ref[...]
    m_new = jnp.maximum(m_prev, jnp.max(d_lse, axis=0, keepdims=True))
    alpha = jnp.exp(m_prev - m_new)
    l_ref[...] = alpha * l_ref[...] + jnp.sum(jnp.exp(d_lse - m_new),
                                              axis=0, keepdims=True)
    m_ref[...] = m_new
    sd_ref[...] += jnp.sum(d_sum, axis=0, keepdims=True)
    dl_ref[...] += jnp.sum(jnp.where(onehot, d, 0.0), axis=0, keepdims=True)

    # --- finalize on the last class step; lane-dense (1, TILE_N) store ---
    @pl.when(j == pl.num_programs(1) - 1)
    def _finalize():
        lse = m_ref[...] + jnp.log(l_ref[...])                   # (1, TILE_N)
        # sum_j log_sm_j = sum_j d_j - C*lse ; log_sm[label] = d_label - lse
        row_sum = sd_ref[...] - float(c_real) * lse
        label_term = dl_ref[...] - lse
        base = smoothing_const / (c_real - 1)
        coef_label = (1.0 - smoothing_const) - base
        o_ref[0] = -base * row_sum - coef_label * label_term


def proxy_nca_loss(x, labels, proxies, smoothing_const=0.1, *,
                   tile_n=256, tile_c=512, mxu_dtype=None,
                   vmem_limit_bytes=None):
    """ProxyNCALoss.forward: x (N, D), labels (N,) int, proxies (C, D) -> f32.

    mxu_dtype=jnp.bfloat16 uses bf16 MXU operands (f32 accumulation);
    None keeps f32 operands for tight parity with the reference math.
    """
    n, d_feat = x.shape
    c, d_feat_p = proxies.shape
    assert d_feat == d_feat_p and c >= 2

    # --- static tiling / padding (lane-dense D and C, sublane-aligned N) ---
    d_pad = ((d_feat + 127) // 128) * 128
    tile_n = max(8, min(int(tile_n), ((n + 7) // 8) * 8))
    tile_n = ((tile_n + 7) // 8) * 8
    n_pad = ((n + tile_n - 1) // tile_n) * tile_n
    grid_n = n_pad // tile_n

    c_pad128 = ((c + 127) // 128) * 128
    tile_c = max(128, min(int(tile_c), c_pad128))
    tile_c = ((tile_c + 127) // 128) * 128
    c_pad = ((c + tile_c - 1) // tile_c) * tile_c
    grid_c = c_pad // tile_c

    # --- hoisted proxy normalization (computed once, not per grid step) ---
    pf = proxies.astype(jnp.float32)
    pn = 3.0 * pf / jnp.maximum(
        jnp.linalg.norm(pf, axis=-1, keepdims=True), 1e-12)
    xf = x.astype(jnp.float32)
    if d_pad != d_feat:            # zero columns change no norm / dot product
        xf = jnp.pad(xf, ((0, 0), (0, d_pad - d_feat)))
        pn = jnp.pad(pn, ((0, 0), (0, d_pad - d_feat)))
    if c_pad != c:                 # padded classes are masked inside the kernel
        pn = jnp.pad(pn, ((0, c_pad - c), (0, 0)))
    if mxu_dtype is not None:
        pn = pn.astype(mxu_dtype)  # halves the streamed proxy DMA + VMEM

    labels_i32 = labels.astype(jnp.int32)
    if n_pad != n:
        xf = jnp.pad(xf, ((0, n_pad - n), (0, 0)))
        labels_i32 = jnp.pad(labels_i32, ((0, n_pad - n),))
    labels3d = labels_i32.reshape(grid_n, 1, tile_n)   # lane-dense label rows

    compute_dtype = jnp.float32 if mxu_dtype is None else mxu_dtype

    if vmem_limit_bytes is None:
        p_bytes = jnp.dtype(compute_dtype).itemsize
        est = (2 * tile_n * d_pad * 4            # X tiles (double-buffered)
               + 2 * tile_c * d_pad * p_bytes    # streamed proxy tiles
               + tile_n * d_pad * p_bytes        # cached normalized X
               + 8 * tile_c * tile_n * 4         # (TILE_C, TILE_N) temporaries
               + (1 << 16))
        # v5e/v6e (128 MiB VMEM) benefit from a bigger limit; keep tiny cases
        # at the safe 32 MiB default (also safe on v7x's 64 MiB/TC).
        vmem_limit_bytes = max(32 * 1024 * 1024,
                               min(2 * est, 100 * 1024 * 1024))

    kernel = functools.partial(
        _proxy_nca_kernel,
        smoothing_const=float(smoothing_const),
        c_real=int(c),
        needs_mask=(c_pad != c))

    rows = pl.pallas_call(
        kernel,
        out_shape=jax.ShapeDtypeStruct((grid_n, 1, tile_n), jnp.float32),
        grid_spec=pltpu.PrefetchScalarGridSpec(
            num_scalar_prefetch=0,
            grid=(grid_n, grid_c),
            in_specs=[
                pl.BlockSpec((tile_n, d_pad), lambda i, j: (i, 0)),    # X tile
                pl.BlockSpec((tile_c, d_pad), lambda i, j: (j, 0)),    # proxies
                pl.BlockSpec((1, 1, tile_n), lambda i, j: (i, 0, 0)),  # labels
            ],
            out_specs=pl.BlockSpec((1, 1, tile_n), lambda i, j: (i, 0, 0)),
            scratch_shapes=[
                pltpu.VMEM((tile_n, d_pad), compute_dtype),  # cached xn
                pltpu.VMEM((1, tile_n), jnp.float32),        # running max
                pltpu.VMEM((1, tile_n), jnp.float32),        # running sum exp
                pltpu.VMEM((1, tile_n), jnp.float32),        # sum_j d
                pltpu.VMEM((1, tile_n), jnp.float32),        # d[label]
            ]),
        compiler_params=pltpu.CompilerParams(
            dimension_semantics=("parallel", "arbitrary"),
            vmem_limit_bytes=int(vmem_limit_bytes)),
    )(xf, pn, labels3d)

    return jnp.mean(rows.reshape(-1)[:n])


def _reference(x, labels, proxies, smoothing_const=0.1):
    """Pure-JAX reference mirroring the PyTorch module."""
    xn = 3.0 * x / jnp.maximum(
        jnp.linalg.norm(x, axis=-1, keepdims=True), 1e-12)
    pn = 3.0 * proxies / jnp.maximum(
        jnp.linalg.norm(proxies, axis=-1, keepdims=True), 1e-12)
    d = (jnp.sum(xn * xn, -1, keepdims=True)
         + jnp.sum(pn * pn, -1)[None, :]
         - 2.0 * jnp.dot(xn, pn.T, precision=lax.Precision.HIGHEST))
    d = jnp.maximum(d, 0.0)
    c = proxies.shape[0]
    t = jax.nn.one_hot(labels, c, dtype=jnp.float32) * (1.0 - smoothing_const)
    t = jnp.where(t == 0, smoothing_const / (c - 1), t)
    log_sm = jax.nn.log_softmax(d, axis=-1)
    return jnp.mean(jnp.sum(-t * log_sm, axis=-1))


if __name__ == "__main__":
    key = jax.random.PRNGKey(0)
    kx, kp, kt, kx2, kp2, kt2 = jax.random.split(key, 6)
    s = 0.1

    # Config 1: small module-like shapes (batch=8, dim=32, classes=16).
    N, D, C = 8, 32, 16
    x = jax.random.normal(kx, (N, D), jnp.float32)
    proxies = jax.random.normal(kp, (C, D), jnp.float32)
    labels = jax.random.randint(kt, (N,), 0, C, dtype=jnp.int32)

    ref = _reference(x, labels, proxies, s)
    out = jax.block_until_ready(proxy_nca_loss(x, labels, proxies, s))
    assert jnp.allclose(out, ref, rtol=1e-3, atol=1e-3), (out, ref)

    # bf16-MXU-operand fast path (looser tolerance).
    out_bf16 = jax.block_until_ready(
        proxy_nca_loss(x, labels, proxies, s, mxu_dtype=jnp.bfloat16))
    assert jnp.allclose(out_bf16, ref, rtol=1e-1, atol=1e-1), (out_bf16, ref)

    # Config 2: exercises N/D/C padding, class masking and the streaming
    # class-axis grid (grid_c > 1).
    N2, D2, C2 = 24, 40, 300
    x2 = jax.random.normal(kx2, (N2, D2), jnp.float32)
    proxies2 = jax.random.normal(kp2, (C2, D2), jnp.float32)
    labels2 = jax.random.randint(kt2, (N2,), 0, C2, dtype=jnp.int32)

    ref2 = _reference(x2, labels2, proxies2, s)
    out2 = jax.block_until_ready(
        proxy_nca_loss(x2, labels2, proxies2, s, tile_n=16, tile_c=128))
    assert jnp.allclose(out2, ref2, rtol=1e-3, atol=1e-3), (out2, ref2)

    print("KERNEL_OK")
</pallas_src>

<mosaic_0001>
module attributes {stable_mosaic.version = 11 : i64} {
  func.func @_proxy_nca_kernel(%arg0: i32, %arg1: i32, %arg2: memref<8x128xf32, #tpu.memory_space<vmem>>, %arg3: memref<128x128xf32, #tpu.memory_space<vmem>>, %arg4: memref<1x1x8xi32, #tpu.memory_space<vmem>>, %arg5: memref<1x1x8xf32, #tpu.memory_space<vmem>>, %arg6: memref<8x128xf32, #tpu.memory_space<vmem>>, %arg7: memref<1x8xf32, #tpu.memory_space<vmem>>, %arg8: memref<1x8xf32, #tpu.memory_space<vmem>>, %arg9: memref<1x8xf32, #tpu.memory_space<vmem>>, %arg10: memref<1x8xf32, #tpu.memory_space<vmem>>) attributes {dimension_semantics = [#tpu.dimension_semantics<parallel>, #tpu.dimension_semantics<arbitrary>], iteration_bounds = array<i64: 1, 1>, scalar_prefetch = 0 : i64, scratch_operands = 5 : i64, tpu.core_type = #tpu.core_type<tc>, window_params = [{transform_indices = @transform_0, window_bounds = array<i64: 8, 128>}, {transform_indices = @transform_1, window_bounds = array<i64: 128, 128>}, {transform_indices = @transform_2, window_bounds = array<i64: 1, 1, 8>}, {transform_indices = @transform_3, window_bounds = array<i64: 1, 1, 8>}]} {
    %c0_i32 = arith.constant 0 : i32
    %0 = arith.cmpi eq, %arg1, %c0_i32 : i32
    %1 = arith.extui %0 : i1 to i32
    %c0_i32_0 = arith.constant 0 : i32
    %2 = arith.cmpi ne, %1, %c0_i32_0 : i32
    scf.if %2 {
      %c0_35 = arith.constant 0 : index
      %c0_36 = arith.constant 0 : index
      %62 = vector.load %arg2[%c0_35, %c0_36] : memref<8x128xf32, #tpu.memory_space<vmem>>, vector<8x128xf32>
      %63 = arith.mulf %62, %62 : vector<8x128xf32>
      %cst_37 = arith.constant dense<0.000000e+00> : vector<8xf32>
      %64 = vector.multi_reduction <add>, %63, %cst_37 [1] : vector<8x128xf32> to vector<8xf32>
      %65 = vector.shape_cast %64 : vector<8xf32> to vector<8x1xf32>
      %cst_38 = arith.constant 3.000000e+00 : f32
      %66 = vector.broadcast %cst_38 : f32 to vector<8x128xf32>
      %67 = arith.mulf %66, %62 : vector<8x128xf32>
      %cst_39 = arith.constant 1.000000e-24 : f32
      %68 = vector.broadcast %cst_39 : f32 to vector<8x1xf32>
      %69 = arith.maximumf %65, %68 : vector<8x1xf32>
      %70 = math.rsqrt %69 : vector<8x1xf32>
      %71 = vector.broadcast %70 : vector<8x1xf32> to vector<8x128xf32>
      %72 = arith.mulf %67, %71 : vector<8x128xf32>
      %c0_40 = arith.constant 0 : index
      %c0_41 = arith.constant 0 : index
      %73 = vector.load %arg6[%c0_40, %c0_41] : memref<8x128xf32, #tpu.memory_space<vmem>>, vector<8x128xf32>
      tpu.vector_store %arg6[%c0_40, %c0_41], %72 {strides = array<i32>} : memref<8x128xf32, #tpu.memory_space<vmem>>, vector<8x128xf32>,
      %cst_42 = arith.constant 0xFF800000 : f32
      %74 = vector.broadcast %cst_42 : f32 to vector<1x8xf32>
      %c0_43 = arith.constant 0 : index
      %c0_44 = arith.constant 0 : index
      %75 = vector.load %arg7[%c0_43, %c0_44] : memref<1x8xf32, #tpu.memory_space<vmem>>, vector<1x8xf32>
      tpu.vector_store %arg7[%c0_43, %c0_44], %74 {strides = array<i32>} : memref<1x8xf32, #tpu.memory_space<vmem>>, vector<1x8xf32>,
      %cst_45 = arith.constant 0.000000e+00 : f32
      %76 = vector.broadcast %cst_45 : f32 to vector<1x8xf32>
      %c0_46 = arith.constant 0 : index
      %c0_47 = arith.constant 0 : index
      %77 = vector.load %arg8[%c0_46, %c0_47] : memref<1x8xf32, #tpu.memory_space<vmem>>, vector<1x8xf32>
      tpu.vector_store %arg8[%c0_46, %c0_47], %76 {strides = array<i32>} : memref<1x8xf32, #tpu.memory_space<vmem>>, vector<1x8xf32>,
      %cst_48 = arith.constant 0.000000e+00 : f32
      %78 = vector.broadcast %cst_48 : f32 to vector<1x8xf32>
      %c0_49 = arith.constant 0 : index
      %c0_50 = arith.constant 0 : index
      %79 = vector.load %arg9[%c0_49, %c0_50] : memref<1x8xf32, #tpu.memory_space<vmem>>, vector<1x8xf32>
      tpu.vector_store %arg9[%c0_49, %c0_50], %78 {strides = array<i32>} : memref<1x8xf32, #tpu.memory_space<vmem>>, vector<1x8xf32>,
      %cst_51 = arith.constant 0.000000e+00 : f32
      %80 = vector.broadcast %cst_51 : f32 to vector<1x8xf32>
      %c0_52 = arith.constant 0 : index
      %c0_53 = arith.constant 0 : index
      %81 = vector.load %arg10[%c0_52, %c0_53] : memref<1x8xf32, #tpu.memory_space<vmem>>, vector<1x8xf32>
      tpu.vector_store %arg10[%c0_52, %c0_53], %80 {strides = array<i32>} : memref<1x8xf32, #tpu.memory_space<vmem>>, vector<1x8xf32>,
    } else {
    }
    %c0 = arith.constant 0 : index
    %c0_1 = arith.constant 0 : index
    %3 = vector.load %arg3[%c0, %c0_1] : memref<128x128xf32, #tpu.memory_space<vmem>>, vector<128x128xf32>
    %c0_2 = arith.constant 0 : index
    %c0_3 = arith.constant 0 : index
    %4 = vector.load %arg6[%c0_2, %c0_3] : memref<8x128xf32, #tpu.memory_space<vmem>>, vector<8x128xf32>
    %cst = arith.constant dense<0.000000e+00> : vector<128x8xf32>
    %5 = tpu.matmul %3, %4, %cst {dimension_numbers = #tpu.dot_dimension_numbers<[1], [1], [0], [0], [0, 0, 1, 0], [], []>} : vector<128x128xf32>, vector<8x128xf32>, vector<128x8xf32> -> vector<128x8xf32>
    %cst_4 = arith.constant 2.000000e+00 : f32
    %6 = vector.broadcast %cst_4 : f32 to vector<128x8xf32>
    %7 = arith.mulf %6, %5 : vector<128x8xf32>
    %cst_5 = arith.constant 1.800000e+01 : f32
    %8 = vector.broadcast %cst_5 : f32 to vector<128x8xf32>
    %9 = arith.subf %8, %7 : vector<128x8xf32>
    %cst_6 = arith.constant 0.000000e+00 : f32
    %10 = vector.broadcast %cst_6 : f32 to vector<128x8xf32>
    %11 = arith.maximumf %9, %10 : vector<128x8xf32>
    %c128_i32 = arith.constant 128 : i32
    %12 = arith.muli %arg1, %c128_i32 : i32
    %13 = tpu.iota {dimensions = array<i32: 0>} : vector<128x1xi32>
    %14 = vector.broadcast %12 : i32 to vector<128x1xi32>
    %15 = arith.addi %14, %13 : vector<128x1xi32>
    %c16_i32 = arith.constant 16 : i32
    %16 = vector.broadcast %c16_i32 : i32 to vector<128x1xi32>
    %17 = arith.cmpi slt, %15, %16 : vector<128x1xi32>
    %cst_7 = arith.constant -1.000000e+30 : f32
    %18 = vector.shape_cast %17 : vector<128x1xi1> to vector<128x1xi1>
    %19 = vector.broadcast %18 : vector<128x1xi1> to vector<128x8xi1>
    %20 = vector.broadcast %cst_7 : f32 to vector<128x8xf32>
    %21 = arith.select %19, %11, %20 : vector<128x8xi1>, vector<128x8xf32>
    %cst_8 = arith.constant 0.000000e+00 : f32
    %22 = vector.shape_cast %17 : vector<128x1xi1> to vector<128x1xi1>
    %23 = vector.broadcast %22 : vector<128x1xi1> to vector<128x8xi1>
    %24 = vector.broadcast %cst_8 : f32 to vector<128x8xf32>
    %25 = arith.select %23, %11, %24 : vector<128x8xi1>, vector<128x8xf32>
    %c0_9 = arith.constant 0 : index
    %c0_10 = arith.constant 0 : index
    %c0_11 = arith.constant 0 : index
    %26 = vector.load %arg4[%c0_9, %c0_10, %c0_11] : memref<1x1x8xi32, #tpu.memory_space<vmem>>, vector<1x1x8xi32>
    %27 = vector.shape_cast %26 : vector<1x1x8xi32> to vector<1x8xi32>
    %28 = vector.broadcast %15 : vector<128x1xi32> to vector<128x8xi32>
    %29 = vector.broadcast %27 : vector<1x8xi32> to vector<128x8xi32>
    %30 = arith.cmpi eq, %28, %29 : vector<128x8xi32>
    %c0_12 = arith.constant 0 : index
    %c0_13 = arith.constant 0 : index
    %31 = vector.load %arg7[%c0_12, %c0_13] : memref<1x8xf32, #tpu.memory_space<vmem>>, vector<1x8xf32>
    %cst_14 = arith.constant dense<0xFF800000> : vector<8xf32>
    %32 = vector.multi_reduction <maximumf>, %21, %cst_14 [0] : vector<128x8xf32> to vector<8xf32>
    %33 = vector.shape_cast %32 : vector<8xf32> to vector<1x8xf32>
    %34 = arith.maximumf %31, %33 : vector<1x8xf32>
    %35 = arith.subf %31, %34 : vector<1x8xf32>
    %36 = math.exp %35 : vector<1x8xf32>
    %c0_15 = arith.constant 0 : index
    %c0_16 = arith.constant 0 : index
    %37 = vector.load %arg8[%c0_15, %c0_16] : memref<1x8xf32, #tpu.memory_space<vmem>>, vector<1x8xf32>
    %38 = arith.mulf %36, %37 : vector<1x8xf32>
    %39 = vector.broadcast %34 : vector<1x8xf32> to vector<128x8xf32>
    %40 = arith.subf %21, %39 : vector<128x8xf32>
    %41 = math.exp %40 : vector<128x8xf32>
    %cst_17 = arith.constant dense<0.000000e+00> : vector<8xf32>
    %42 = vector.multi_reduction <add>, %41, %cst_17 [0] : vector<128x8xf32> to vector<8xf32>
    %43 = vector.shape_cast %42 : vector<8xf32> to vector<1x8xf32>
    %44 = arith.addf %38, %43 : vector<1x8xf32>
    %c0_18 = arith.constant 0 : index
    %c0_19 = arith.constant 0 : index
    %45 = vector.load %arg8[%c0_18, %c0_19] : memref<1x8xf32, #tpu.memory_space<vmem>>, vector<1x8xf32>
    tpu.vector_store %arg8[%c0_18, %c0_19], %44 {strides = array<i32>} : memref<1x8xf32, #tpu.memory_space<vmem>>, vector<1x8xf32>,
    %c0_20 = arith.constant 0 : index
    %c0_21 = arith.constant 0 : index
    %46 = vector.load %arg7[%c0_20, %c0_21] : memref<1x8xf32, #tpu.memory_space<vmem>>, vector<1x8xf32>
    tpu.vector_store %arg7[%c0_20, %c0_21], %34 {strides = array<i32>} : memref<1x8xf32, #tpu.memory_space<vmem>>, vector<1x8xf32>,
    %c0_22 = arith.constant 0 : index
    %c0_23 = arith.constant 0 : index
    %47 = vector.load %arg9[%c0_22, %c0_23] : memref<1x8xf32, #tpu.memory_space<vmem>>, vector<1x8xf32>
    %cst_24 = arith.constant dense<0.000000e+00> : vector<8xf32>
    %48 = vector.multi_reduction <add>, %25, %cst_24 [0] : vector<128x8xf32> to vector<8xf32>
    %49 = vector.shape_cast %48 : vector<8xf32> to vector<1x8xf32>
    %50 = arith.addf %47, %49 : vector<1x8xf32>
    %c0_25 = arith.constant 0 : index
    %c0_26 = arith.constant 0 : index
    %51 = vector.load %arg9[%c0_25, %c0_26] : memref<1x8xf32, #tpu.memory_space<vmem>>, vector<1x8xf32>
    tpu.vector_store %arg9[%c0_25, %c0_26], %50 {strides = array<i32>} : memref<1x8xf32, #tpu.memory_space<vmem>>, vector<1x8xf32>,
    %c0_27 = arith.constant 0 : index
    %c0_28 = arith.constant 0 : index
    %52 = vector.load %arg10[%c0_27, %c0_28] : memref<1x8xf32, #tpu.memory_space<vmem>>, vector<1x8xf32>
    %cst_29 = arith.constant 0.000000e+00 : f32
    %53 = vector.broadcast %cst_29 : f32 to vector<128x8xf32>
    %54 = arith.select %30, %11, %53 : vector<128x8xi1>, vector<128x8xf32>
    %cst_30 = arith.constant dense<0.000000e+00> : vector<8xf32>
    %55 = vector.multi_reduction <add>, %54, %cst_30 [0] : vector<128x8xf32> to vector<8xf32>
    %56 = vector.shape_cast %55 : vector<8xf32> to vector<1x8xf32>
    %57 = arith.addf %52, %56 : vector<1x8xf32>
    %c0_31 = arith.constant 0 : index
    %c0_32 = arith.constant 0 : index
    %58 = vector.load %arg10[%c0_31, %c0_32] : memref<1x8xf32, #tpu.memory_space<vmem>>, vector<1x8xf32>
    tpu.vector_store %arg10[%c0_31, %c0_32], %57 {strides = array<i32>} : memref<1x8xf32, #tpu.memory_space<vmem>>, vector<1x8xf32>,
    %c0_i32_33 = arith.constant 0 : i32
    %59 = arith.cmpi eq, %arg1, %c0_i32_33 : i32
    %60 = arith.extui %59 : i1 to i32
    %c0_i32_34 = arith.constant 0 : i32
    %61 = arith.cmpi ne, %60, %c0_i32_34 : i32
    scf.if %61 {
      %c0_35 = arith.constant 0 : index
      %c0_36 = arith.constant 0 : index
      %62 = vector.load %arg7[%c0_35, %c0_36] : memref<1x8xf32, #tpu.memory_space<vmem>>, vector<1x8xf32>
      %c0_37 = arith.constant 0 : index
      %c0_38 = arith.constant 0 : index
      %63 = vector.load %arg8[%c0_37, %c0_38] : memref<1x8xf32, #tpu.memory_space<vmem>>, vector<1x8xf32>
      %64 = math.log %63 : vector<1x8xf32>
      %65 = arith.addf %62, %64 : vector<1x8xf32>
      %c0_39 = arith.constant 0 : index
      %c0_40 = arith.constant 0 : index
      %66 = vector.load %arg9[%c0_39, %c0_40] : memref<1x8xf32, #tpu.memory_space<vmem>>, vector<1x8xf32>
      %cst_41 = arith.constant 1.600000e+01 : f32
      %67 = vector.broadcast %cst_41 : f32 to vector<1x8xf32>
      %68 = arith.mulf %67, %65 : vector<1x8xf32>
      %69 = arith.subf %66, %68 : vector<1x8xf32>
      %c0_42 = arith.constant 0 : index
      %c0_43 = arith.constant 0 : index
      %70 = vector.load %arg10[%c0_42, %c0_43] : memref<1x8xf32, #tpu.memory_space<vmem>>, vector<1x8xf32>
      %71 = arith.subf %70, %65 : vector<1x8xf32>
      %cst_44 = arith.constant -0.00666666683 : f32
      %72 = vector.broadcast %cst_44 : f32 to vector<1x8xf32>
      %73 = arith.mulf %72, %69 : vector<1x8xf32>
      %cst_45 = arith.constant 0.893333315 : f32
      %74 = vector.broadcast %cst_45 : f32 to vector<1x8xf32>
      %75 = arith.mulf %74, %71 : vector<1x8xf32>
      %76 = arith.subf %73, %75 : vector<1x8xf32>
      %c0_46 = arith.constant 0 : index
      %c0_47 = arith.constant 0 : index
      %c0_48 = arith.constant 0 : index
      %77 = vector.load %arg5[%c0_46, %c0_47, %c0_48] : memref<1x1x8xf32, #tpu.memory_space<vmem>>, vector<1x1x8xf32>
      %78 = vector.shape_cast %77 : vector<1x1x8xf32> to vector<1x8xf32>
      %79 = vector.shape_cast %76 : vector<1x8xf32> to vector<1x1x8xf32>
      tpu.vector_store %arg5[%c0_46, %c0_47, %c0_48], %79 {strides = array<i32>} : memref<1x1x8xf32, #tpu.memory_space<vmem>>, vector<1x1x8xf32>,
    } else {
    }
    return
  }
  func.func @transform_0(%arg0: i32, %arg1: i32) -> (i32, i32) {
    %c0_i32 = arith.constant 0 : i32
    %c0_i32_0 = arith.constant 0 : i32
    return %arg0, %c0_i32 : i32, i32
  }
  func.func @transform_1(%arg0: i32, %arg1: i32) -> (i32, i32) {
    %c0_i32 = arith.constant 0 : i32
    %c0_i32_0 = arith.constant 0 : i32
    return %arg1, %c0_i32 : i32, i32
  }
  func.func @transform_2(%arg0: i32, %arg1: i32) -> (i32, i32, i32) {
    %c0_i32 = arith.constant 0 : i32
    %c0_i32_0 = arith.constant 0 : i32
    %c0_i32_1 = arith.constant 0 : i32
    return %arg0, %c0_i32, %c0_i32_0 : i32, i32, i32
  }
  func.func @transform_3(%arg0: i32, %arg1: i32) -> (i32, i32, i32) {
    %c0_i32 = arith.constant 0 : i32
    %c0_i32_0 = arith.constant 0 : i32
    %c0_i32_1 = arith.constant 0 : i32
    return %arg0, %c0_i32, %c0_i32_0 : i32, i32, i32
  }
}

</mosaic_0001>

<bundles_post_ra>
// kernel: tpu_custom_call.1
= control target key start
LH: loop header
LB: loop body
LE: loop exit
PB: predicated region body
PF: predicated region fallthrough
CT: control target
= control target key end

     0   :  { %8 = vsyncpa [#allocation8], 0  ;;  %s880_s0 = inlined_call_operand.hbm [shape: f32[8,128], index: 0, kind: input, shape index: {}]   ;;  %s881_s1 = inlined_call_operand.hbm [shape: f32[128,128], index: 1, kind: input, shape index: {}]   ;;  %s882_s2 = inlined_call_operand.vmem [shape: s32[1,1,8], index: 2, kind: input, shape index: {}]   ;;  %s883_s3 = inlined_call_operand.hbm [shape: f32[1,1,8], index: 3, kind: output, shape index: {}]  }
   0x1   :  { %9 = vsyncpa [#allocation11], 0 }
   0x2   :  { %10 = vsyncpa [#allocation9], 0  ;;  %s16_s14 = sshll.u32 %s880_s0, 4  ;;  %s704_s15 = smov [#allocation7]   ;;  %s17_s14 = int_to_ptr.hbm [resolvable:$true] %s16_s14 }
   0x3   :  { %s18_s16 = sshll.u32 %s704_s15, 4  ;;  %s26_s19 = sshll.u32 %s881_s1, 4  ;;  %s19_s16 = int_to_ptr.vmem [resolvable:$true] %s18_s16  ;;  %s27_s19 = int_to_ptr.hbm [resolvable:$true] %s26_s19 }
   0x4   :  { %21 = dma.hbm_to_vmem [thread:$0]  %s17_s14, 128, %s19_s16, [#allocation8]  }
   0x5   :  { %s705_s20 = smov [#allocation10]   ;;  %s706_s22 = smov 128  }
   0x6   :  { %s28_s21 = sshll.u32 %s705_s20, 4  ;;  %s707_s23 = smov 8   ;;  %s29_s21 = int_to_ptr.vmem [resolvable:$true] %s28_s21 }
   0x7   :  { %34 = dma.hbm_to_vmem [thread:$0]  %s27_s19, 2048, %s29_s21, [#allocation11], %s706_s22, %s706_s22, %s707_s23  }
   0x8   :  { %698 = dma.done.wait [#allocation8], 128  }
   0x9   :  { %699 = vsyncadd [#allocation8], 4294967168 }
   0xa   :  { %700 = dma.done.wait [#allocation11], 2048  }
   0xb   :  { %701 = vsyncadd [#allocation11], 4294965248  ;;  %v49_v0 = vld [vmem:[#allocation7] sm:$0xff]  ;;  %v72_v13 = vld [vmem:[#allocation10] sm:$0xff]  ;;  %vm67_vm3 = vcmask 57344   ;;  %v708_v29 = vmov -inf   ;;  %v203_v35 = vlaneseq }
   0xc   :  { %v50_v1 = vmul.f32 %v49_v0, %v49_v0  ;;  %v53_v9 = vmul.f32 3.0, %v49_v0  ;;  %v76_v14 = vld [vmem:[#allocation10 + $0x20] sm:$0xff]  ;;  %v73_v17 = vld [vmem:[#allocation10 + $0x8] sm:$0xff]  ;;  %v74_v21 = vld [vmem:[#allocation10 + $0x10] sm:$0xff]  ;;  %68 = vst.msk [vmem:[#allocation3] sm:$0x1] %vm67_vm3, %v708_v29 }
   0xd   :  { %v80_v15 = vld [vmem:[#allocation10 + $0x40] sm:$0xff]  ;;  %v77_v18 = vld [vmem:[#allocation10 + $0x28] sm:$0xff]  ;;  %v78_v22 = vld [vmem:[#allocation10 + $0x30] sm:$0xff]  ;;  %v709_v30 = vmov 0.0   ;;  %vm336_vm4 = vcmask 64512   ;;  %v745_v41 = vshrl.u32 %v203_v35, 7 }
   0xe   :  { %51 = vadd.xlane.f32.xlu0 %v50_v1  ;;  %v84_v16 = vld [vmem:[#allocation10 + $0x60] sm:$0xff]  ;;  %v81_v19 = vld [vmem:[#allocation10 + $0x48] sm:$0xff]  ;;  %v82_v23 = vld [vmem:[#allocation10 + $0x50] sm:$0xff]  ;;  %69 = vst.msk [vmem:[#allocation4] sm:$0x1] %vm67_vm3, %v709_v30  ;;  %s592_s27 = sshll.u32 %s883_s3, 4  ;;  %s593_s27 = int_to_ptr.hbm [resolvable:$true] %s592_s27 }
   0xf   :  { %v85_v20 = vld [vmem:[#allocation10 + $0x68] sm:$0xff]  ;;  %v86_v24 = vld [vmem:[#allocation10 + $0x70] sm:$0xff]  ;;  %v75_v25 = vld [vmem:[#allocation10 + $0x18] sm:$0xff]  ;;  %70 = vst.msk [vmem:[#allocation5] sm:$0x1] %vm67_vm3, %v709_v30  ;;  %v208_v48 = vadd.s32 32, %v745_v41 }
  0x10   :  { %v79_v26 = vld [vmem:[#allocation10 + $0x38] sm:$0xff]  ;;  %71 = vst.msk [vmem:[#allocation6] sm:$0x1] %vm67_vm3, %v709_v30  ;;  %v339_v44 = vsel %vm336_vm4, -1e+30, %v708_v29  ;;  %v205_v49 = vadd.s32 8, %v745_v41 }
  0x11   :  { %v83_v27 = vld [vmem:[#allocation10 + $0x58] sm:$0xff]  ;;  %v753_v46 = vld [vmem:[%s882_s2] ss:$0 sm:$0xff]  ;;  %v206_v50 = vadd.s32 16, %v745_v41  ;;  %s710_s2 = smov [#allocation12]  }
  0x12   :  { %v87_v28 = vld [vmem:[#allocation10 + $0x78] sm:$0xff]  ;;  %vm319_vm5 = vcmp.eq.s32.totalorder %v745_v41, %v753_v46  ;;  %vm323_vm6 = vcmp.eq.s32.totalorder %v208_v48, %v753_v46  ;;  %vm320_vm7 = vcmp.eq.s32.totalorder %v205_v49, %v753_v46  ;;  %s590_s24 = sshll.u32 %s710_s2, 4  ;;  %s591_s24 = int_to_ptr.vmem [resolvable:$true] %s590_s24 }
  0x13   :  { %vm321_vm8 = vcmp.eq.s32.totalorder %v206_v50, %v753_v46 }
  0x81   :  { %v52_v2 = vpop.xlane.xlu0 %51 }
  0x82   :  { %v54_v3 = vmax.f32 %v52_v2, 1e-24 }
  0x84   :  { %614 = vrsqrt.f32 %v54_v3  ;;  %vm61_vm1 = vweird.f32 %v54_v3 }
  0x8a   :  { %v615_v4 = vpop.eup %614 }
  0x8b   :  { %v56_v5 = vmul.f32 %v615_v4, %v54_v3  ;;  %vm62_vm0 = vweird.f32 %v615_v4 }
  0x8c   :  { %vm63_vm2 = vmor %vm61_vm1, %vm62_vm0 }
  0x8d   :  { %v57_v6 = vmul.f32 %v615_v4, %v56_v5  ;;  %v775_v5 = vadd.s32 24, %v745_v41 }
  0x8f   :  { %v58_v7 = vmul.f32 0.5, %v57_v6  ;;  %v778_v6 = vadd.s32 48, %v745_v41  ;;  %vm322_vm10 = vcmp.eq.s32.totalorder %v775_v5, %v753_v46 }
  0x91   :  { %v59_v8 = vsub.f32 1.5, %v58_v7  ;;  %vm325_vm11 = vcmp.eq.s32.totalorder %v778_v6, %v753_v46 }
  0x93   :  { %v60_v10 = vmul.f32 %v615_v4, %v59_v8 }
  0x95   :  { %v64_v11 = vsel %vm63_vm2, %v615_v4, %v60_v10  ;;  %v209_v4 = vadd.s32 40, %v745_v41  ;;  %v783_v10 = vadd.s32 56, %v745_v41 }
  0x96   :  { %v65_v12 = vmul.f32 %v64_v11, %v53_v9 }
  0x97   :  { %vm324_vm9 = vcmp.eq.s32.totalorder %v209_v4, %v753_v46  ;;  %vm326_vm13 = vcmp.eq.s32.totalorder %v783_v10, %v753_v46 }
  0x98   :  { %104 = vmatpush.xpose.msra.mxu0 %v65_v12  ;;  %603 = vmatpush.xpose.msra.mxu1 %v65_v12 }
  0x99   :  { %604 = vmatpush.xpose.msra.mxu2 %v65_v12  ;;  %605 = vmatpush.xpose.msra.mxu3 %v65_v12 }
  0x9b   :  { %105 = vmatmul.f32.vlgmr.msra.gmra.mxu0 %v72_v13  ;;  %117 = vmatmul.f32.vlgmr.msra.gmra.mxu1 %v76_v14  ;;  %v212_v14 = vadd.s32 64, %v745_v41 }
  0x9c   :  { %129 = vmatmul.f32.vlgmr.msra.gmra.mxu2 %v80_v15  ;;  %141 = vmatmul.f32.vlgmr.msra.gmra.mxu3 %v84_v16 }
  0x9d   :  { %vm327_vm12 = vcmp.eq.s32.totalorder %v212_v14, %v753_v46 }
  0xa3   :  { %108 = vmatmul.f32.gmra.mxu0 %v73_v17  ;;  %120 = vmatmul.f32.gmra.mxu1 %v77_v18 }
  0xa4   :  { %132 = vmatmul.f32.gmra.mxu2 %v81_v19  ;;  %144 = vmatmul.f32.gmra.mxu3 %v85_v20 }
  0xab   :  { %111 = vmatmul.f32.gmra.mxu0 %v74_v21  ;;  %123 = vmatmul.f32.gmra.mxu1 %v78_v22 }
  0xac   :  { %135 = vmatmul.f32.gmra.mxu2 %v82_v23  ;;  %147 = vmatmul.f32.gmra.mxu3 %v86_v24 }
  0xb3   :  { %114 = vmatmul.f32.gmra.mxu0 %v75_v25  ;;  %126 = vmatmul.f32.gmra.mxu1 %v79_v26  ;;  %v802_v26 = vadd.s32 72, %v745_v41 }
  0xb4   :  { %138 = vmatmul.f32.gmra.mxu2 %v83_v27  ;;  %150 = vmatmul.f32.gmra.mxu3 %v87_v28 }
  0xb5   :  { %vm328_vm14 = vcmp.eq.s32.totalorder %v802_v26, %v753_v46 }
 0x118   :  { %v106_v31 = vpop.f32.mrf.mxu0  ;;  %v118_v32 = vpop.f32.mrf.mxu1 }
 0x119   :  { %v154_v33 = vmul.f32 2.0, %v106_v31  ;;  %v158_v37 = vmul.f32 2.0, %v118_v32 }
 0x11b   :  { %v170_v34 = vsub.f32 18.0, %v154_v33  ;;  %v174_v47 = vsub.f32 18.0, %v158_v37 }
 0x11d   :  { %v741_v36 = vmax.f32 %v170_v34, 0.0  ;;  %v190_v54 = vmax.f32 %v174_v47, 0.0  ;;  %v472_v47 = vld [vmem:[#allocation5] sm:$0x1] }
 0x11f   :  { %v130_v38 = vpop.f32.mrf.mxu2  ;;  %v743_v39 = vpop.f32.mrf.mxu3  ;;  %v337_v43 = vsel %vm336_vm4, %v741_v36, -inf  ;;  %v473_v55 = vsel %vm336_vm4, %v741_v36, 0.0  ;;  %v517_v9 = vsel %vm323_vm6, %v190_v54, 0.0  ;;  %v513_v12 = vsel %vm319_vm5, %v741_v36, 0.0 }
 0x120   :  { %v109_v40 = vpop.f32.mrf.mxu0  ;;  %v121_v42 = vpop.f32.mrf.mxu1  ;;  %v342_v52 = vmax.f32 %v337_v43, %v339_v44  ;;  %v162_v58 = vmul.f32 2.0, %v130_v38  ;;  %v536_v23 = vsel %vm336_vm4, %v517_v9, 0.0  ;;  %v529_v25 = vsel %vm336_vm4, %v513_v12, 0.0 }
 0x121   :  { %v155_v45 = vmul.f32 2.0, %v109_v40  ;;  %v159_v1 = vmul.f32 2.0, %v121_v42 }
 0x122   :  { %v350_v61 = vmax.f32 %v342_v52, %v339_v44  ;;  %v178_v13 = vsub.f32 18.0, %v162_v58  ;;  %v214_v52 = vadd.s32 80, %v745_v41 }
 0x123   :  { %v171_v51 = vsub.f32 18.0, %v155_v45  ;;  %v175_v18 = vsub.f32 18.0, %v159_v1 }
 0x124   :  { %v358_v15 = vmax.f32 %v350_v61, %v339_v44  ;;  %v194_v31 = vmax.f32 %v178_v13, 0.0  ;;  %vm329_vm15 = vcmp.eq.s32.totalorder %v214_v52, %v753_v46 }
 0x125   :  { %v758_v53 = vmax.f32 %v171_v51, 0.0  ;;  %v191_v30 = vmax.f32 %v175_v18, 0.0  ;;  %v216_v18 = vadd.s32 96, %v745_v41 }
 0x126   :  { %v521_v58 = vsel %vm327_vm12, %v194_v31, 0.0 }
 0x127   :  { %v338_v56 = vsel %vm336_vm4, %v758_v53, -inf  ;;  %v474_v57 = vsel %vm336_vm4, %v758_v53, 0.0  ;;  %v133_v59 = vpop.f32.mrf.mxu2  ;;  %v771_v60 = vpop.f32.mrf.mxu3  ;;  %v514_v24 = vsel %vm320_vm7, %v758_v53, 0.0  ;;  %vm331_vm0 = vcmp.eq.s32.totalorder %v216_v18, %v753_v46 }
 0x128   :  { %v344_v62 = vmax.f32 %v338_v56, %v339_v44  ;;  %v475_v63 = vadd.f32 %v474_v57, %v473_v55  ;;  %v112_v0 = vpop.f32.mrf.mxu0  ;;  %v124_v2 = vpop.f32.mrf.mxu1  ;;  %v530_v43 = vsel %vm336_vm4, %v514_v24, 0.0  ;;  %v163_v45 = vmul.f32 2.0, %v133_v59 }
 0x129   :  { %v156_v3 = vmul.f32 2.0, %v112_v0  ;;  %v160_v20 = vmul.f32 2.0, %v124_v2  ;;  %v166_v56 = vmul.f32 2.0, %v743_v39  ;;  %v531_v57 = vadd.f32 %v530_v43, %v529_v25 }
 0x12a   :  { %v352_v7 = vmax.f32 %v344_v62, %v339_v44  ;;  %v504_v8 = vrot.slane %v475_v63, 4  ;;  %v518_v0 = vsel %vm324_vm9, %v191_v30, 0.0  ;;  %v179_v1 = vsub.f32 18.0, %v163_v45 }
 0x12b   :  { %v172_v11 = vsub.f32 18.0, %v156_v3  ;;  %v176_v37 = vsub.f32 18.0, %v160_v20  ;;  %v167_v12 = vmul.f32 2.0, %v771_v60  ;;  %v182_v14 = vsub.f32 18.0, %v166_v56 }
 0x12c   :  { %v360_v16 = vmax.f32 %v352_v7, %v339_v44  ;;  %v505_v17 = vadd.f32 %v504_v8, %v475_v63  ;;  %v217_v43 = vadd.s32 104, %v745_v41  ;;  %v219_v56 = vadd.s32 120, %v745_v41 }
 0x12d   :  { %v188_v19 = vmax.f32 %v172_v11, 0.0  ;;  %v192_v61 = vmax.f32 %v176_v37, 0.0  ;;  %v183_v25 = vsub.f32 18.0, %v167_v12  ;;  %v198_v31 = vmax.f32 %v182_v14, 0.0 }
 0x12e   :  { %v365_v21 = vmax.f32 %v358_v15, %v360_v16  ;;  %v506_v22 = vrot.slane %v505_v17, 2  ;;  %v538_v16 = vsel %vm336_vm4, %v518_v0, 0.0  ;;  %vm332_vm2 = vcmp.eq.s32.totalorder %v217_v43, %v753_v46 }
 0x12f   :  { %v136_v27 = vpop.f32.mrf.mxu2  ;;  %v515_v34 = vsel %vm321_vm8, %v188_v19, 0.0  ;;  %v519_v13 = vsel %vm325_vm11, %v192_v61, 0.0  ;;  %v830_v19 = vld [vmem:[#allocation3] sm:$0x1]  ;;  %v525_v61 = vsel %vm331_vm0, %v198_v31, 0.0  ;;  %vm334_vm6 = vcmp.eq.s32.totalorder %v219_v56, %v753_v46 }
 0x130   :  { %v367_v28 = vmax.f32 %v365_v21, %v339_v44  ;;  %v507_v29 = vadd.f32 %v506_v22, %v505_v17  ;;  %v115_v32 = vpop.f32.mrf.mxu0  ;;  %v127_v33 = vpop.f32.mrf.mxu1  ;;  %v164_v51 = vmul.f32 2.0, %v136_v27  ;;  %v532_v55 = vsel %vm336_vm4, %v515_v34, 0.0  ;;  %v512_v31 = vld [vmem:[#allocation6] sm:$0x1] }
 0x131   :  { %v157_v35 = vmul.f32 2.0, %v115_v32  ;;  %v161_v38 = vmul.f32 2.0, %v127_v33  ;;  %v148_v44 = vpop.f32.mrf.mxu3  ;;  %v533_v2 = vadd.f32 %v532_v55, %v531_v57  ;;  %v195_v17 = vmax.f32 %v179_v1, 0.0 }
 0x132   :  { %v368_v40 = vrot.slane %v367_v28, 4  ;;  %v508_v42 = vrot.slane %v507_v29, 1  ;;  %v180_v8 = vsub.f32 18.0, %v164_v51  ;;  %v540_v6 = vsel %vm336_vm4, %v519_v13, 0.0 }
 0x133   :  { %v173_v48 = vsub.f32 18.0, %v157_v35  ;;  %v177_v49 = vsub.f32 18.0, %v161_v38  ;;  %v215_v27 = vadd.s32 88, %v745_v41  ;;  %v168_v32 = vmul.f32 2.0, %v148_v44 }
 0x134   :  { %v369_v50 = vmax.f32 %v367_v28, %v368_v40  ;;  %v509_v54 = vadd.f32 %v508_v42, %v507_v29  ;;  %v196_v21 = vmax.f32 %v180_v8, 0.0  ;;  %v544_v29 = vsel %vm336_vm4, %v521_v58, 0.0 }
 0x135   :  { %v189_v59 = vmax.f32 %v173_v48, 0.0  ;;  %v193_v7 = vmax.f32 %v177_v49, 0.0  ;;  %v522_v10 = vsel %vm328_vm14, %v195_v17, 0.0  ;;  %v199_v42 = vmax.f32 %v183_v25, 0.0 }
 0x136   :  { %v370_v62 = vrot.slane %v369_v50, 2  ;;  %v510_v63 = vadd.f32 %v509_v54, %v472_v47  ;;  %v523_v35 = vsel %vm329_vm15, %v196_v21, 0.0  ;;  %vm330_vm1 = vcmp.eq.s32.totalorder %v215_v27, %v753_v46 }
 0x137   :  { %v516_v3 = vsel %vm322_vm10, %v189_v59, 0.0  ;;  %v139_v39 = vpop.f32.mrf.mxu2  ;;  %v520_v60 = vsel %vm326_vm13, %v193_v7, 0.0  ;;  %v546_v26 = vsel %vm336_vm4, %v522_v10, 0.0  ;;  %v184_v44 = vsub.f32 18.0, %v168_v32 }
 0x138   :  { %v371_v9 = vmax.f32 %v369_v50, %v370_v62  ;;  %511 = vst.msk [vmem:[#allocation5] sm:$0x1] %vm67_vm3, %v510_v63  ;;  %v534_v11 = vsel %vm336_vm4, %v516_v3, 0.0  ;;  %v165_v5 = vmul.f32 2.0, %v139_v39  ;;  %v542_v33 = vsel %vm336_vm4, %v520_v60, 0.0 }
 0x139   :  { %v535_v4 = vadd.f32 %v534_v11, %v533_v2  ;;  %v151_v28 = vpop.f32.mrf.mxu3  ;;  %v218_v47 = vadd.s32 112, %v745_v41  ;;  %v548_v52 = vsel %vm336_vm4, %v523_v35, 0.0  ;;  %v526_v0 = vsel %vm332_vm2, %v199_v42, 0.0 }
 0x13a   :  { %v372_v15 = vrot.slane %v371_v9, 1  ;;  %v181_v22 = vsub.f32 18.0, %v165_v5  ;;  %v169_v38 = vmul.f32 2.0, %v151_v28  ;;  %v552_v41 = vsel %vm336_vm4, %v525_v61, 0.0 }
 0x13b   :  { %v537_v20 = vadd.f32 %v536_v23, %v535_v4  ;;  %vm333_vm5 = vcmp.eq.s32.totalorder %v218_v47, %v753_v46  ;;  %v554_v7 = vsel %vm336_vm4, %v526_v0, 0.0 }
 0x13c   :  { %v373_v24 = vmax.f32 %v371_v9, %v372_v15  ;;  %v197_v37 = vmax.f32 %v181_v22, 0.0  ;;  %v185_v55 = vsub.f32 18.0, %v169_v38 }
 0x13d   :  { %v539_v30 = vadd.f32 %v538_v16, %v537_v20 }
 0x13e   :  { %v839_v23 = vmax.f32 %v830_v19, %v373_v24  ;;  %v524_v54 = vsel %vm330_vm1, %v197_v37, 0.0  ;;  %v201_v1 = vmax.f32 %v185_v55, 0.0 }
 0x13f   :  { %v541_v34 = vadd.f32 %v540_v6, %v539_v30 }
 0x140   :  { %v381_v40 = vperm.slane %v839_v23, 0  ;;  %471 = vst.msk [vmem:[#allocation3] sm:$0x1] %vm67_vm3, %v839_v23  ;;  %v528_v39 = vsel %vm334_vm6, %v201_v1, 0.0 }
 0x141   :  { %v543_v45 = vadd.f32 %v542_v33, %v541_v34  ;;  %v558_v15 = vsel %vm336_vm4, %v528_v39, 0.0 }
 0x142   :  { %v383_v48 = vsub.f32 %v741_v36, %v381_v40  ;;  %v384_v49 = vsub.f32 %v758_v53, %v381_v40  ;;  %v385_v51 = vsub.f32 -1e+30, %v381_v40  ;;  %v200_v36 = vmax.f32 %v184_v44, 0.0 }
 0x143   :  { %v545_v50 = vadd.f32 %v544_v29, %v543_v45  ;;  %v550_v53 = vsel %vm336_vm4, %v524_v54, 0.0  ;;  %v375_v40 = vsub.f32 %v830_v19, %v839_v23 }
 0x144   :  { %v399_v57 = vmul.f32 1.442695, %v383_v48  ;;  %v401_v58 = vmul.f32 1.442695, %v384_v49  ;;  %v403_v59 = vmul.f32 1.442695, %v385_v51 }
 0x145   :  { %v547_v62 = vadd.f32 %v546_v26, %v545_v50  ;;  %v527_v3 = vsel %vm333_vm5, %v200_v36, 0.0  ;;  %v376_v26 = vmul.f32 1.442695, %v375_v40 }
 0x146   :  { %616 = vpow2.f32 %v399_v57  ;;  %v556_v11 = vsel %vm336_vm4, %v527_v3, 0.0 }
 0x147   :  { %618 = vpow2.f32 %v401_v58  ;;  %v549_v63 = vadd.f32 %v548_v52, %v547_v62  ;;  %v378_v52 = vld [vmem:[#allocation4] sm:$0x1]  ;;  %v571_v58 = vld [vmem:[#allocation3] sm:$0x1] }
 0x148   :  { %620 = vpow2.f32 %v403_v59 }
 0x149   :  { %v551_v2 = vadd.f32 %v550_v53, %v549_v63  ;;  %622 = vpow2.f32 %v376_v26  ;;  %v576_v53 = vld [vmem:[#allocation5] sm:$0x1] }
 0x14b   :  { %v553_v8 = vadd.f32 %v552_v41, %v551_v2 }
 0x14c   :  { %v617_v9 = vpop.eup %616 }
 0x14d   :  { %v619_v12 = vpop.eup %618  ;;  %v431_v4 = vsel %vm336_vm4, %v617_v9, 0.0  ;;  %v555_v13 = vadd.f32 %v554_v7, %v553_v8 }
 0x14e   :  { %v621_v14 = vpop.eup %620  ;;  %v432_v5 = vsel %vm336_vm4, %v619_v12, 0.0 }
 0x14f   :  { %v433_v16 = vadd.f32 %v432_v5, %v431_v4  ;;  %v557_v46 = vadd.f32 %v556_v11, %v555_v13  ;;  %v434_v17 = vsel %vm336_vm4, %v621_v14, 0.0  ;;  %v623_v51 = vpop.eup %622 }
 0x150   :  { %v379_v54 = vmul.f32 %v623_v51, %v378_v52 }
 0x151   :  { %v435_v18 = vadd.f32 %v434_v17, %v433_v16  ;;  %v559_v20 = vadd.f32 %v558_v15, %v557_v46 }
 0x153   :  { %v437_v60 = vadd.f32 %v435_v18, %v434_v17  ;;  %v560_v21 = vrot.slane %v559_v20, 4 }
 0x155   :  { %v439_v22 = vadd.f32 %v437_v60, %v434_v17  ;;  %v561_v24 = vadd.f32 %v560_v21, %v559_v20 }
 0x157   :  { %v441_v6 = vadd.f32 %v439_v22, %v434_v17  ;;  %v562_v25 = vrot.slane %v561_v24, 2 }
 0x159   :  { %v443_v27 = vadd.f32 %v441_v6, %v434_v17  ;;  %v563_v28 = vadd.f32 %v562_v25, %v561_v24 }
 0x15b   :  { %v445_v29 = vadd.f32 %v443_v27, %v434_v17  ;;  %v564_v30 = vrot.slane %v563_v28, 1 }
 0x15d   :  { %v447_v32 = vadd.f32 %v445_v29, %v434_v17  ;;  %v565_v10 = vadd.f32 %v564_v30, %v563_v28 }
 0x15f   :  { %v449_v33 = vadd.f32 %v447_v32, %v434_v17  ;;  %v566_v34 = vadd.f32 %v565_v10, %v512_v31 }
 0x161   :  { %v451_v35 = vadd.f32 %v449_v33, %v434_v17  ;;  %567 = vst.msk [vmem:[#allocation6] sm:$0x1] %vm67_vm3, %v566_v34 }
 0x163   :  { %v453_v37 = vadd.f32 %v451_v35, %v434_v17 }
 0x165   :  { %v455_v38 = vadd.f32 %v453_v37, %v434_v17 }
 0x167   :  { %v457_v42 = vadd.f32 %v455_v38, %v434_v17 }
 0x168   :  { %v579_v61 = vld [vmem:[#allocation6] sm:$0x1] }
 0x169   :  { %v459_v43 = vadd.f32 %v457_v42, %v434_v17 }
 0x16b   :  { %v461_v45 = vadd.f32 %v459_v43, %v434_v17 }
 0x16d   :  { %v462_v44 = vrot.slane %v461_v45, 4 }
 0x16f   :  { %v463_v47 = vadd.f32 %v462_v44, %v461_v45 }
 0x171   :  { %v464_v48 = vrot.slane %v463_v47, 2 }
 0x173   :  { %v465_v49 = vadd.f32 %v464_v48, %v463_v47 }
 0x175   :  { %v466_v50 = vrot.slane %v465_v49, 1 }
 0x177   :  { %v467_v55 = vadd.f32 %v466_v50, %v465_v49 }
 0x179   :  { %v468_v56 = vadd.f32 %v467_v55, %v379_v54 }
 0x17b   :  { %470 = vst.msk [vmem:[#allocation4] sm:$0x1] %vm67_vm3, %v468_v56 }
 0x182   :  { %v572_v57 = vld [vmem:[#allocation4] sm:$0x1] }
 0x183   :  { %624 = vlog2.f32 %v572_v57 }
 0x189   :  { %v625_v19 = vpop.eup %624 }
 0x18a   :  { %v574_v23 = vmul.f32 0.6931472, %v625_v19 }
 0x18c   :  { %v575_v59 = vadd.f32 %v574_v23, %v571_v58 }
 0x18e   :  { %v577_v62 = vmul.f32 16.0, %v575_v59  ;;  %v580_v36 = vsub.f32 %v579_v61, %v575_v59 }
 0x190   :  { %v578_v63 = vsub.f32 %v576_v53, %v577_v62  ;;  %v582_v1 = vmul.f32 0.8933333, %v580_v36 }
 0x192   :  { %v581_v0 = vmul.f32 -0.006666667, %v578_v63 }
 0x194   :  { %v583_v41 = vsub.f32 %v581_v0, %v582_v1 }
 0x196   :  { %584 = vst.msk [vmem:[#allocation12] sm:$0x1] %vm67_vm3, %v583_v41 }
 0x197   :  { %595 = dma.vmem_to_hbm [thread:$0]  %s591_s24, 16, %s593_s27, [#allocation9]  }
 0x198   :  { %702 = dma.done.wait [#allocation9], 16  }
 0x199   :  { %703 = vsyncadd [#allocation9], 4294967280 }
 0x19a   :  { %600 = vsyncpa [#allocation8], 1 }
 0x19b   :  { %601 = vsyncpa [#allocation11], 1 }
 0x19c   :  { %602 = vsyncpa [#allocation9], 1 }

</bundles_post_ra>
